<compile_context>
chip_gen: v5e
topology: v5e:2x2
jax: 0.10.0
libtpu: 0.0.40
codegen_flags: <defaults>
</compile_context>

<pallas_src>
import functools

import jax
import jax.numpy as jnp
from jax.experimental import pallas as pl
from jax.experimental.pallas import tpu as pltpu

LANE = 128
SUBLANE = 8
IGNORE_LABEL = 255


def _detect_num_cores():
    """2 TensorCores per chip only on v7x; v5e/v6e are single-TC."""
    try:
        kind = jax.devices()[0].device_kind.lower()
    except Exception:
        return 1
    return 2 if ("v7" in kind or "7x" in kind) else 1


NUM_CORES = _detect_num_cores()
# Larger tiles amortize the ~0.35us per-grid-step overhead; v7x's faster HBM
# makes per-tile DMA short enough that 8192 rows pays off there.
DEFAULT_MAX_TILE_R = 8192 if NUM_CORES == 2 else 4096
VMEM_LIMIT_BYTES = 32 * 1024 * 1024  # covers 2 inputs x 2 buffers at max tile


def _row_granularity(dtype):
    """Sublane-packing granularity (rows of 128 lanes): f32->8, bf16->16, u8->32."""
    itemsize = jnp.dtype(dtype).itemsize
    return SUBLANE * max(1, 4 // itemsize)


def _dice_sums_kernel(p_ref, t_ref, out_ref, *, tile_r, rows,
                      blocks_per_core, full_blocks, needs_mask_path):
    """Accumulates per-core (3, 8, 128) partial sums of
       [pred*target, pred, target] (masked, unscaled)."""
    c = pl.program_id(0)   # core slice ("parallel")
    i = pl.program_id(1)   # reduction step ("arbitrary")

    @pl.when(i == 0)
    def _():
        out_ref[...] = jnp.zeros_like(out_ref)

    p = p_ref[...].astype(jnp.float32)   # bf16 -> f32 upcast happens in VMEM
    t = t_ref[...]                       # int32 or uint8
    valid = t != IGNORE_LABEL            # ignore-label mask

    def fold(x):
        # (tile_r, 128) -> (8, 128) partials: leading-axis sum = pure VPU adds,
        # no cross-lane (XLU) reduction in the hot loop.
        return jnp.sum(x.reshape(tile_r // SUBLANE, SUBLANE, LANE), axis=0)

    def accumulate(v):
        # NOTE: must stay a select (jnp.where), not a multiply — out-of-bounds
        # rows of edge/surplus blocks hold undefined (possibly NaN) data.
        tf = jnp.where(v, t.astype(jnp.float32), 0.0)
        pf = jnp.where(v, p, 0.0)
        out_ref[0, 0] += fold(pf * tf)
        out_ref[0, 1] += fold(pf)
        out_ref[0, 2] += fold(tf)

    if not needs_mask_path:
        accumulate(valid)                       # every block is full: fast path
    else:
        g = c * blocks_per_core + i             # un-clamped global block index

        @pl.when(g < full_blocks)               # full blocks: unmasked fast path
        def _():
            accumulate(valid)

        @pl.when(g >= full_blocks)              # ragged last / surplus block only
        def _():
            row0 = g * tile_r
            row_idx = jax.lax.broadcasted_iota(jnp.int32, (tile_r, LANE), 0) + row0
            accumulate(jnp.logical_and(valid, row_idx < rows))


@functools.partial(jax.jit, static_argnames=("smooth", "max_tile_r"))
def dice_loss(predictions, targets, smooth=1e-6, max_tile_r=None):
    """predictions: (N, 1, H, W) float32/bfloat16; targets: (N, H, W) int32/uint8
    class labels in [0, 18] with 255 = ignore.  `max_tile_r` is a test-only
    override (must respect the dtype row granularity)."""
    n, c, h, w = predictions.shape
    assert c == 1, "DiceLoss squeezes channel dim; expects C == 1"
    total = n * h * w

    p_flat = predictions.reshape(-1)   # keep caller dtype (f32 or bf16)
    t_flat = targets.reshape(-1)       # keep caller dtype (int32 or uint8)

    row_align = max(_row_granularity(p_flat.dtype), _row_granularity(t_flat.dtype))
    align = row_align * LANE
    main = (total // align) * align    # aligned prefix handled by the kernel
    tail = total - main                # < row_align*128 elems, handled in JAX

    inter = jnp.float32(0.0)
    p_sum = jnp.float32(0.0)
    t_sum = jnp.float32(0.0)

    if main > 0:
        rows = main // LANE            # multiple of row_align
        p2 = (p_flat if tail == 0 else p_flat[:main]).reshape(rows, LANE)
        t2 = (t_flat if tail == 0 else t_flat[:main]).reshape(rows, LANE)

        mtr = DEFAULT_MAX_TILE_R if max_tile_r is None else max_tile_r
        tile_r = min(mtr, rows)        # multiple of row_align by construction
        blocks = pl.cdiv(rows, tile_r)
        blocks_per_core = pl.cdiv(blocks, NUM_CORES)
        full_blocks = rows // tile_r
        # Static (trace-time) decision: the masked slow path is emitted only if
        # some grid step can touch a ragged or surplus (clamped) block.
        needs_mask_path = (full_blocks != NUM_CORES * blocks_per_core)

        kernel = functools.partial(
            _dice_sums_kernel, tile_r=tile_r, rows=rows,
            blocks_per_core=blocks_per_core, full_blocks=full_blocks,
            needs_mask_path=needs_mask_path)

        def in_map(ci, ii):
            # Clamp so a core's surplus step re-reads the last valid block; its
            # contribution is zeroed by the in-kernel row mask.
            return (jnp.minimum(ci * blocks_per_core + ii, blocks - 1), 0)

        partials = pl.pallas_call(
            kernel,
            out_shape=jax.ShapeDtypeStruct((NUM_CORES, 3, SUBLANE, LANE),
                                           jnp.float32),
            grid_spec=pl.GridSpec(
                grid=(NUM_CORES, blocks_per_core),
                in_specs=[
                    pl.BlockSpec((tile_r, LANE), in_map),
                    pl.BlockSpec((tile_r, LANE), in_map),
                ],
                out_specs=pl.BlockSpec((1, 3, SUBLANE, LANE),
                                       lambda ci, ii: (ci, 0, 0, 0)),
            ),
            compiler_params=pltpu.CompilerParams(
                dimension_semantics=("parallel", "arbitrary"),
                vmem_limit_bytes=VMEM_LIMIT_BYTES),
        )(p2, t2)

        inter = inter + jnp.sum(partials[:, 0])
        p_sum = p_sum + jnp.sum(partials[:, 1])
        t_sum = t_sum + jnp.sum(partials[:, 2])

    if tail > 0:
        # Tiny ragged tail (< row_align*128 elements) reduced in plain JAX.
        pt = p_flat[main:].astype(jnp.float32)
        tt = t_flat[main:]
        m = tt != IGNORE_LABEL
        tf = jnp.where(m, tt.astype(jnp.float32), 0.0)
        pf = jnp.where(m, pt, 0.0)
        inter = inter + jnp.sum(pf * tf)
        p_sum = p_sum + jnp.sum(pf)
        t_sum = t_sum + jnp.sum(tf)

    # /18 label scaling + dice formula hoisted out of the kernel.
    inter = inter / 18.0
    t_sum = t_sum / 18.0
    dice = (2.0 * inter + smooth) / (p_sum + t_sum + smooth)
    return 1.0 - dice


def _dice_loss_ref(predictions, targets, smooth=1e-6):
    """Pure-JAX reference mirroring the PyTorch forward."""
    p = predictions[:, 0].astype(jnp.float32)   # squeeze(1)
    mask = targets != IGNORE_LABEL
    tf = jnp.where(mask, targets.astype(jnp.float32) / 18.0, 0.0)
    pf = jnp.where(mask, p, 0.0)
    inter = jnp.sum(pf * tf)
    dice = (2.0 * inter + smooth) / (jnp.sum(pf) + jnp.sum(tf) + smooth)
    return 1.0 - dice


def _make_inputs(key, n, h, w, pred_dtype, tgt_dtype):
    kp, kt, km = jax.random.split(key, 3)
    preds = jax.random.uniform(kp, (n, 1, h, w), dtype=pred_dtype)
    tgts = jax.random.randint(kt, (n, h, w), 0, 19, dtype=jnp.int32)
    ignore = jax.random.bernoulli(km, 0.2, (n, h, w))
    tgts = jnp.where(ignore, jnp.int32(IGNORE_LABEL), tgts).astype(tgt_dtype)
    return preds, tgts


if __name__ == "__main__":
    key = jax.random.PRNGKey(0)
    k1, k2, k3, k4 = jax.random.split(key, 4)

    # 1) Aligned f32 preds / int32 targets (pure kernel path, no tail).
    p1, t1 = _make_inputs(k1, 2, 64, 64, jnp.float32, jnp.int32)
    l1 = dice_loss(p1, t1)
    jax.block_until_ready(l1)
    assert jnp.allclose(l1, _dice_loss_ref(p1, t1), rtol=1e-5, atol=1e-5), l1

    # 2) Unaligned bf16 preds / uint8 targets (kernel prefix + JAX tail,
    #    narrow-dtype HBM traffic, in-kernel f32 upcast).
    p2, t2 = _make_inputs(k2, 2, 61, 67, jnp.bfloat16, jnp.uint8)
    l2 = dice_loss(p2, t2)
    jax.block_until_ready(l2)
    assert jnp.allclose(l2, _dice_loss_ref(p2, t2), rtol=1e-4, atol=1e-5), l2

    # 3) Tiny input below one aligned block (pure-JAX fallback path).
    p3, t3 = _make_inputs(k3, 2, 16, 16, jnp.float32, jnp.int32)
    l3 = dice_loss(p3, t3)
    jax.block_until_ready(l3)
    assert jnp.allclose(l3, _dice_loss_ref(p3, t3), rtol=1e-5, atol=1e-5), l3

    # 4) Force a ragged last block inside the kernel (exercises the runtime
    #    pl.when-gated row-mask path) via the test-only max_tile_r override.
    p4, t4 = _make_inputs(k4, 2, 48, 96, jnp.float32, jnp.int32)  # rows=72
    l4 = dice_loss(p4, t4, max_tile_r=16)
    jax.block_until_ready(l4)
    assert jnp.allclose(l4, _dice_loss_ref(p4, t4), rtol=1e-5, atol=1e-5), l4

    print("KERNEL_OK")
</pallas_src>

<mosaic_0001>
module attributes {stable_mosaic.version = 11 : i64} {
  func.func @_dice_sums_kernel(%arg0: i32, %arg1: i32, %arg2: memref<64x128xf32, #tpu.memory_space<vmem>>, %arg3: memref<64x128xi32, #tpu.memory_space<vmem>>, %arg4: memref<1x3x8x128xf32, #tpu.memory_space<vmem>>) attributes {dimension_semantics = [#tpu.dimension_semantics<parallel>, #tpu.dimension_semantics<arbitrary>], iteration_bounds = array<i64: 1, 1>, scalar_prefetch = 0 : i64, scratch_operands = 0 : i64, tpu.core_type = #tpu.core_type<tc>, window_params = [{transform_indices = @transform_0, window_bounds = array<i64: 64, 128>}, {transform_indices = @transform_1, window_bounds = array<i64: 64, 128>}, {transform_indices = @transform_2, window_bounds = array<i64: 1, 3, 8, 128>}]} {
    %c0_i32 = arith.constant 0 : i32
    %0 = arith.cmpi eq, %arg1, %c0_i32 : i32
    %1 = arith.extui %0 : i1 to i32
    %c0_i32_0 = arith.constant 0 : i32
    %2 = arith.cmpi ne, %1, %c0_i32_0 : i32
    scf.if %2 {
      %cst_30 = arith.constant 0.000000e+00 : f32
      %37 = vector.broadcast %cst_30 : f32 to vector<1x3x8x128xf32>
      %c0_31 = arith.constant 0 : index
      %c0_32 = arith.constant 0 : index
      %c0_33 = arith.constant 0 : index
      %c0_34 = arith.constant 0 : index
      %38 = vector.load %arg4[%c0_31, %c0_32, %c0_33, %c0_34] : memref<1x3x8x128xf32, #tpu.memory_space<vmem>>, vector<1x3x8x128xf32>
      tpu.vector_store %arg4[%c0_31, %c0_32, %c0_33, %c0_34], %37 {strides = array<i32>} : memref<1x3x8x128xf32, #tpu.memory_space<vmem>>, vector<1x3x8x128xf32>,
    } else {
    }
    %c0 = arith.constant 0 : index
    %c0_1 = arith.constant 0 : index
    %3 = vector.load %arg2[%c0, %c0_1] : memref<64x128xf32, #tpu.memory_space<vmem>>, vector<64x128xf32>
    %c0_2 = arith.constant 0 : index
    %c0_3 = arith.constant 0 : index
    %4 = vector.load %arg3[%c0_2, %c0_3] : memref<64x128xi32, #tpu.memory_space<vmem>>, vector<64x128xi32>
    %c255_i32 = arith.constant 255 : i32
    %5 = vector.broadcast %c255_i32 : i32 to vector<64x128xi32>
    %6 = arith.cmpi ne, %4, %5 : vector<64x128xi32>
    %7 = arith.sitofp %4 : vector<64x128xi32> to vector<64x128xf32>
    %cst = arith.constant 0.000000e+00 : f32
    %8 = vector.broadcast %cst : f32 to vector<64x128xf32>
    %9 = arith.select %6, %7, %8 : vector<64x128xi1>, vector<64x128xf32>
    %cst_4 = arith.constant 0.000000e+00 : f32
    %10 = vector.broadcast %cst_4 : f32 to vector<64x128xf32>
    %11 = arith.select %6, %3, %10 : vector<64x128xi1>, vector<64x128xf32>
    %c0_5 = arith.constant 0 : index
    %c0_6 = arith.constant 0 : index
    %c0_7 = arith.constant 0 : index
    %c0_8 = arith.constant 0 : index
    %12 = vector.load %arg4[%c0_5, %c0_6, %c0_7, %c0_8] : memref<1x3x8x128xf32, #tpu.memory_space<vmem>>, vector<1x1x8x128xf32>
    %13 = vector.shape_cast %12 : vector<1x1x8x128xf32> to vector<8x128xf32>
    %14 = arith.mulf %11, %9 : vector<64x128xf32>
    %15 = vector.shape_cast %14 : vector<64x128xf32> to vector<8x8x128xf32>
    %cst_9 = arith.constant dense<0.000000e+00> : vector<8x128xf32>
    %16 = vector.multi_reduction <add>, %15, %cst_9 [0] : vector<8x8x128xf32> to vector<8x128xf32>
    %17 = arith.addf %13, %16 : vector<8x128xf32>
    %c0_10 = arith.constant 0 : index
    %c0_11 = arith.constant 0 : index
    %c0_12 = arith.constant 0 : index
    %c0_13 = arith.constant 0 : index
    %18 = vector.load %arg4[%c0_10, %c0_11, %c0_12, %c0_13] : memref<1x3x8x128xf32, #tpu.memory_space<vmem>>, vector<1x1x8x128xf32>
    %19 = vector.shape_cast %18 : vector<1x1x8x128xf32> to vector<8x128xf32>
    %20 = vector.shape_cast %17 : vector<8x128xf32> to vector<1x1x8x128xf32>
    tpu.vector_store %arg4[%c0_10, %c0_11, %c0_12, %c0_13], %20 {strides = array<i32>} : memref<1x3x8x128xf32, #tpu.memory_space<vmem>>, vector<1x1x8x128xf32>,
    %c0_14 = arith.constant 0 : index
    %c1 = arith.constant 1 : index
    %c0_15 = arith.constant 0 : index
    %c0_16 = arith.constant 0 : index
    %21 = vector.load %arg4[%c0_14, %c1, %c0_15, %c0_16] : memref<1x3x8x128xf32, #tpu.memory_space<vmem>>, vector<1x1x8x128xf32>
    %22 = vector.shape_cast %21 : vector<1x1x8x128xf32> to vector<8x128xf32>
    %23 = vector.shape_cast %11 : vector<64x128xf32> to vector<8x8x128xf32>
    %cst_17 = arith.constant dense<0.000000e+00> : vector<8x128xf32>
    %24 = vector.multi_reduction <add>, %23, %cst_17 [0] : vector<8x8x128xf32> to vector<8x128xf32>
    %25 = arith.addf %22, %24 : vector<8x128xf32>
    %c0_18 = arith.constant 0 : index
    %c1_19 = arith.constant 1 : index
    %c0_20 = arith.constant 0 : index
    %c0_21 = arith.constant 0 : index
    %26 = vector.load %arg4[%c0_18, %c1_19, %c0_20, %c0_21] : memref<1x3x8x128xf32, #tpu.memory_space<vmem>>, vector<1x1x8x128xf32>
    %27 = vector.shape_cast %26 : vector<1x1x8x128xf32> to vector<8x128xf32>
    %28 = vector.shape_cast %25 : vector<8x128xf32> to vector<1x1x8x128xf32>
    tpu.vector_store %arg4[%c0_18, %c1_19, %c0_20, %c0_21], %28 {strides = array<i32>} : memref<1x3x8x128xf32, #tpu.memory_space<vmem>>, vector<1x1x8x128xf32>,
    %c0_22 = arith.constant 0 : index
    %c2 = arith.constant 2 : index
    %c0_23 = arith.constant 0 : index
    %c0_24 = arith.constant 0 : index
    %29 = vector.load %arg4[%c0_22, %c2, %c0_23, %c0_24] : memref<1x3x8x128xf32, #tpu.memory_space<vmem>>, vector<1x1x8x128xf32>
    %30 = vector.shape_cast %29 : vector<1x1x8x128xf32> to vector<8x128xf32>
    %31 = vector.shape_cast %9 : vector<64x128xf32> to vector<8x8x128xf32>
    %cst_25 = arith.constant dense<0.000000e+00> : vector<8x128xf32>
    %32 = vector.multi_reduction <add>, %31, %cst_25 [0] : vector<8x8x128xf32> to vector<8x128xf32>
    %33 = arith.addf %30, %32 : vector<8x128xf32>
    %c0_26 = arith.constant 0 : index
    %c2_27 = arith.constant 2 : index
    %c0_28 = arith.constant 0 : index
    %c0_29 = arith.constant 0 : index
    %34 = vector.load %arg4[%c0_26, %c2_27, %c0_28, %c0_29] : memref<1x3x8x128xf32, #tpu.memory_space<vmem>>, vector<1x1x8x128xf32>
    %35 = vector.shape_cast %34 : vector<1x1x8x128xf32> to vector<8x128xf32>
    %36 = vector.shape_cast %33 : vector<8x128xf32> to vector<1x1x8x128xf32>
    tpu.vector_store %arg4[%c0_26, %c2_27, %c0_28, %c0_29], %36 {strides = array<i32>} : memref<1x3x8x128xf32, #tpu.memory_space<vmem>>, vector<1x1x8x128xf32>,
    return
  }
  func.func @transform_0(%arg0: i32, %arg1: i32) -> (i32, i32) {
    %c1_i32 = arith.constant 1 : i32
    %0 = arith.muli %arg0, %c1_i32 : i32
    %1 = arith.addi %0, %arg1 : i32
    %c0_i32 = arith.constant 0 : i32
    %2 = arith.minsi %1, %c0_i32 : i32
    %c0_i32_0 = arith.constant 0 : i32
    %c0_i32_1 = arith.constant 0 : i32
    return %2, %c0_i32_0 : i32, i32
  }
  func.func @transform_1(%arg0: i32, %arg1: i32) -> (i32, i32) {
    %c1_i32 = arith.constant 1 : i32
    %0 = arith.muli %arg0, %c1_i32 : i32
    %1 = arith.addi %0, %arg1 : i32
    %c0_i32 = arith.constant 0 : i32
    %2 = arith.minsi %1, %c0_i32 : i32
    %c0_i32_0 = arith.constant 0 : i32
    %c0_i32_1 = arith.constant 0 : i32
    return %2, %c0_i32_0 : i32, i32
  }
  func.func @transform_2(%arg0: i32, %arg1: i32) -> (i32, i32, i32, i32) {
    %c0_i32 = arith.constant 0 : i32
    %c0_i32_0 = arith.constant 0 : i32
    %c0_i32_1 = arith.constant 0 : i32
    %c0_i32_2 = arith.constant 0 : i32
    return %arg0, %c0_i32, %c0_i32_0, %c0_i32_1 : i32, i32, i32, i32
  }
}

</mosaic_0001>

<bundles_post_ra>
// kernel: dice_loss.1
= control target key start
LH: loop header
LB: loop body
LE: loop exit
PB: predicated region body
PF: predicated region fallthrough
CT: control target
= control target key end

     0   :  { %s269_s1 = inlined_call_operand.vmem [shape: s32[64,128], index: 1, kind: input, shape index: {}]   ;;  %s270_s0 = inlined_call_operand.vmem [shape: f32[64,128], index: 0, kind: input, shape index: {}]   ;;  %s271_s2 = inlined_call_operand.vmem [shape: f32[1,3,8,128], index: 2, kind: output, shape index: {}]  }
   0x1   :  { %v90_v0 = vld [vmem:[%s269_s1] sm:$0xff]  ;;  %v91_v1 = vld [vmem:[%s269_s1 + $0x8] sm:$0xff]  ;;  %v92_v2 = vld [vmem:[%s269_s1 + $0x10] sm:$0xff] }
   0x2   :  { %v93_v3 = vld [vmem:[%s269_s1 + $0x18] sm:$0xff]  ;;  %v106_v4 = vcvt.s32.f32 %v90_v0  ;;  %v107_v5 = vcvt.s32.f32 %v91_v1  ;;  %v94_v6 = vld [vmem:[%s269_s1 + $0x20] sm:$0xff]  ;;  %vm98_vm0 = vcmp.ne.s32.totalorder %v90_v0, 255  ;;  %vm99_vm1 = vcmp.ne.s32.totalorder %v91_v1, 255  ;;  %v83_v9 = vld [vmem:[%s270_s0 + $0x8] sm:$0xff] }
   0x3   :  { %v108_v7 = vcvt.s32.f32 %v92_v2  ;;  %v82_v8 = vld [vmem:[%s270_s0] sm:$0xff]  ;;  %vm100_vm2 = vcmp.ne.s32.totalorder %v92_v2, 255  ;;  %v109_v10 = vcvt.s32.f32 %v93_v3  ;;  %v84_v11 = vld [vmem:[%s270_s0 + $0x10] sm:$0xff]  ;;  %v85_v12 = vld [vmem:[%s270_s0 + $0x18] sm:$0xff]  ;;  %vm101_vm3 = vcmp.ne.s32.totalorder %v93_v3, 255 }
   0x4   :  { %v95_v13 = vld [vmem:[%s269_s1 + $0x28] sm:$0xff]  ;;  %v110_v14 = vcvt.s32.f32 %v94_v6  ;;  %v114_v15 = vsel %vm98_vm0, %v106_v4, 0.0  ;;  %v115_v16 = vsel %vm99_vm1, %v107_v5, 0.0  ;;  %v86_v17 = vld [vmem:[%s270_s0 + $0x20] sm:$0xff]  ;;  %v96_v18 = vld [vmem:[%s269_s1 + $0x30] sm:$0xff]  ;;  %vm102_vm4 = vcmp.ne.s32.totalorder %v94_v6, 255 }
   0x5   :  { %v116_v19 = vsel %vm100_vm2, %v108_v7, 0.0  ;;  %v122_v20 = vsel %vm98_vm0, %v82_v8, 0.0  ;;  %v123_v21 = vsel %vm99_vm1, %v83_v9, 0.0  ;;  %v111_v22 = vcvt.s32.f32 %v95_v13  ;;  %v87_v26 = vld [vmem:[%s270_s0 + $0x28] sm:$0xff]  ;;  %v97_v27 = vld [vmem:[%s269_s1 + $0x38] sm:$0xff]  ;;  %v88_v34 = vld [vmem:[%s270_s0 + $0x30] sm:$0xff] }
   0x6   :  { %v117_v23 = vsel %vm101_vm3, %v109_v10, 0.0  ;;  %v124_v24 = vsel %vm100_vm2, %v84_v11, 0.0  ;;  %v125_v25 = vsel %vm101_vm3, %v85_v12, 0.0  ;;  %vm103_vm5 = vcmp.ne.s32.totalorder %v95_v13, 255  ;;  %v89_v42 = vld [vmem:[%s270_s0 + $0x38] sm:$0xff] }
   0x7   :  { %v131_v28 = vmul.f32 %v122_v20, %v114_v15  ;;  %v132_v29 = vmul.f32 %v123_v21, %v115_v16  ;;  %v112_v30 = vcvt.s32.f32 %v96_v18  ;;  %v118_v31 = vsel %vm102_vm4, %v110_v14, 0.0 }
   0x8   :  { %v126_v32 = vsel %vm102_vm4, %v86_v17, 0.0  ;;  %v133_v33 = vmul.f32 %v124_v24, %v116_v19  ;;  %vm104_vm6 = vcmp.ne.s32.totalorder %v96_v18, 255  ;;  %v134_v35 = vmul.f32 %v125_v25, %v117_v23 }
   0x9   :  { %v139_v36 = vadd.f32 %v132_v29, %v131_v28  ;;  %v150_v37 = vadd.f32 %v123_v21, %v122_v20  ;;  %v113_v38 = vcvt.s32.f32 %v97_v27  ;;  %v119_v39 = vsel %vm103_vm5, %v111_v22, 0.0 }
   0xa   :  { %v127_v40 = vsel %vm103_vm5, %v87_v26, 0.0  ;;  %v161_v41 = vadd.f32 %v115_v16, %v114_v15  ;;  %vm105_vm7 = vcmp.ne.s32.totalorder %v97_v27, 255  ;;  %v135_v43 = vmul.f32 %v126_v32, %v118_v31 }
   0xb   :  { %v140_v44 = vadd.f32 %v139_v36, %v133_v33  ;;  %v151_v45 = vadd.f32 %v150_v37, %v124_v24  ;;  %v120_v46 = vsel %vm104_vm6, %v112_v30, 0.0  ;;  %v128_v47 = vsel %vm104_vm6, %v88_v34, 0.0 }
   0xc   :  { %v162_v48 = vadd.f32 %v161_v41, %v116_v19  ;;  %v136_v49 = vmul.f32 %v127_v40, %v119_v39  ;;  %v121_v52 = vsel %vm105_vm7, %v113_v38, 0.0  ;;  %v129_v53 = vsel %vm105_vm7, %v89_v42, 0.0 }
   0xd   :  { %v141_v50 = vadd.f32 %v140_v44, %v134_v35  ;;  %v152_v51 = vadd.f32 %v151_v45, %v125_v25  ;;  %v137_v55 = vmul.f32 %v128_v47, %v120_v46  ;;  %v138_v59 = vmul.f32 %v129_v53, %v121_v52 }
   0xe   :  { %v163_v54 = vadd.f32 %v162_v48, %v117_v23 }
   0xf   :  { %v142_v56 = vadd.f32 %v141_v50, %v135_v43  ;;  %v153_v57 = vadd.f32 %v152_v51, %v126_v32 }
  0x10   :  { %v164_v58 = vadd.f32 %v163_v54, %v118_v31 }
  0x11   :  { %v143_v60 = vadd.f32 %v142_v56, %v136_v49  ;;  %v154_v61 = vadd.f32 %v153_v57, %v127_v40 }
  0x12   :  { %v165_v62 = vadd.f32 %v164_v58, %v119_v39 }
  0x13   :  { %v144_v63 = vadd.f32 %v143_v60, %v137_v55  ;;  %v155_v0 = vadd.f32 %v154_v61, %v128_v47 }
  0x14   :  { %v166_v1 = vadd.f32 %v165_v62, %v120_v46 }
  0x15   :  { %v145_v2 = vadd.f32 %v144_v63, %v138_v59  ;;  %v156_v3 = vadd.f32 %v155_v0, %v129_v53 }
  0x16   :  { %v167_v4 = vadd.f32 %v166_v1, %v121_v52 }
  0x17   :  { %147 = vst [vmem:[%s271_s2] sm:$0xff] %v145_v2 }
  0x18   :  { %187 = vst [vmem:[%s271_s2 + $0x8] sm:$0xff] %v156_v3 }
  0x19   :  { %189 = vst [vmem:[%s271_s2 + $0x10] sm:$0xff] %v167_v4 }

</bundles_post_ra>
